<compile_context>
chip_gen: v5e
topology: v5e:2x2
jax: 0.10.0
libtpu: 0.0.40
codegen_flags: <defaults>
</compile_context>

<pallas_src>
import functools
import numpy as np

import jax
import jax.numpy as jnp
from jax.experimental import pallas as pl
from jax.experimental.pallas import tpu as pltpu


def _round_up(x, m):
    return ((x + m - 1) // m) * m


def g_mapping_kernel(x_ref, w_ref, b_ref, o_ref, *, eps, negative_slope):
    """PixelNorm + L scaled-linear layers + leaky_relu on one batch tile."""
    x = x_ref[...].astype(jnp.float32)                        # [TB, D]

    # --- PixelNorm (reduction over feature axis) ---
    mean_sq = jnp.mean(x * x, axis=1, keepdims=True)          # [TB, 1]
    x = x * jax.lax.rsqrt(mean_sq + eps)

    # --- L FC layers, unrolled so the LLO scheduler can overlap each layer's
    #     weight loads with the previous layer's MXU drain.  Single `x` binding
    #     keeps only one live [TB, D] intermediate.
    num_layers = w_ref.shape[0]
    for l in range(num_layers):
        w = w_ref[l]                                          # [D_in, D_out] bf16 (w_lrmul folded)
        b = b_ref[l].astype(jnp.float32)                      # [D_out]       f32  (b_lrmul folded)
        y = jnp.dot(x.astype(jnp.bfloat16), w,
                    preferred_element_type=jnp.float32) + b[None, :]
        # leaky_relu(y, slope) == max(y, slope*y) for 0 < slope < 1 (slope=0.2 here)
        x = jnp.maximum(y, negative_slope * y)

    o_ref[...] = x.astype(o_ref.dtype)


def g_mapping_pallas(x, w_stack_bf16, b_stack, *, eps=1e-8, negative_slope=0.2,
                     max_rows_per_tile=1024, num_parallel_tiles=None):
    """x: [B, D] f32; w_stack_bf16: [L, D_in, D_out] bf16 (w_lrmul folded in);
    b_stack: [L, D_out] f32 (b_lrmul folded in).

    num_parallel_tiles: force the number of batch tiles (e.g. 2 on v7x so each
    TensorCore gets exactly one large tile).  Default: as few tiles as possible
    (one, for any batch <= max_rows_per_tile)."""
    B, D = x.shape
    L, Din, Dout = w_stack_bf16.shape
    assert Din == D and Dout == D and b_stack.shape == (L, D)
    assert 0.0 < negative_slope < 1.0

    Bp = _round_up(B, 8)
    if num_parallel_tiles is None:
        num_tiles = max(1, -(-Bp // max_rows_per_tile))       # cdiv
    else:
        num_tiles = max(1, int(num_parallel_tiles))
    TB = _round_up(-(-Bp // num_tiles), 8)                    # rows per tile, sublane-aligned
    Bp = TB * num_tiles
    if Bp != B:
        # Zero padding is safe: padded rows give mean_sq=0 -> 0*rsqrt(eps)=0 through
        # PixelNorm and stay harmless through the FCs; they are sliced off below.
        x = jnp.pad(x, ((0, Bp - B), (0, 0)))
    grid = (num_tiles,)

    kernel = functools.partial(
        g_mapping_kernel,
        eps=float(eps),
        negative_slope=float(negative_slope),
    )

    out_dtype = jnp.float32
    bytes_accessed = (
        Bp * D * 4                 # activations in
        + L * D * D * 2            # bf16 weight stack
        + L * D * 4                # biases
        + Bp * D * 4               # output
    )
    cost = pl.CostEstimate(
        flops=2 * Bp * D * D * L,
        transcendentals=Bp,        # one rsqrt per row
        bytes_accessed=bytes_accessed,
    )

    out = pl.pallas_call(
        kernel,
        out_shape=jax.ShapeDtypeStruct((Bp, D), out_dtype),
        grid=grid,
        in_specs=[
            # Batch-tiled activations (double-buffered by default; fine).
            pl.BlockSpec((TB, D), lambda i: (i, 0)),
            # VMEM-resident weight stack: constant index_map, copied once ->
            # single-buffer to avoid a dead second copy in VMEM.
            pl.BlockSpec((L, D, D), lambda i: (0, 0, 0),
                         pipeline_mode=pl.Buffered(1)),
            pl.BlockSpec((L, D), lambda i: (0, 0),
                         pipeline_mode=pl.Buffered(1)),
        ],
        out_specs=pl.BlockSpec((TB, D), lambda i: (i, 0)),
        compiler_params=pltpu.CompilerParams(
            dimension_semantics=("parallel",),   # shards batch tiles across v7x TCs
        ),
        cost_estimate=cost,
    )(x, w_stack_bf16, b_stack)

    if Bp != B:
        out = out[:B]
    return out


def make_g_mapping_params(key, mapping_fmaps, dlatent_size, num_fc=8,
                          gain=2 ** 0.5, lrmul=0.01, use_wscale=True):
    """Synthetic init mirroring FC.__init__ (use_wscale=True path), with the
    runtime scales (w_lrmul, b_lrmul) folded into the parameters.

    Returns f32 folded stacks: w_stack [L, D_in, D_out], b_stack [L, D_out]."""
    assert mapping_fmaps == dlatent_size, "stacked-weight kernel assumes equal dims"
    D = dlatent_size
    he_std = gain * (D ** -0.5)
    if use_wscale:
        init_std = 1.0 / lrmul
        w_lrmul = he_std * lrmul
    else:
        init_std = he_std / lrmul
        w_lrmul = lrmul

    keys = jax.random.split(key, num_fc)
    ws = []
    for l in range(num_fc):
        # torch: Parameter(randn(out, in) * init_std); stored transposed [in, out],
        # with the static w_lrmul folded in.
        w = jax.random.normal(keys[l], (D, D), dtype=jnp.float32) * init_std
        ws.append(w.T * w_lrmul)
    w_stack = jnp.stack(ws, axis=0)                            # [L, D_in, D_out], pre-scaled
    # bias init = zeros (b_lrmul fold is a no-op on zeros).
    b_stack = jnp.zeros((num_fc, D), dtype=jnp.float32)
    return w_stack, b_stack


def reference_forward_f32(x, w_stack_f32, b_stack, eps=1e-8):
    """Pure-JAX f32 reference matching the PyTorch module (scales pre-folded)."""
    mean_sq = jnp.mean(x * x, axis=1, keepdims=True)
    x = x * jax.lax.rsqrt(mean_sq + eps)
    for l in range(w_stack_f32.shape[0]):
        y = x @ w_stack_f32[l] + b_stack[l]
        x = jnp.where(y >= 0, y, 0.2 * y)
    return x


def reference_forward_bf16(x, w_stack_bf16, b_stack, eps=1e-8):
    """Precision-matched reference: bf16 dot operands, f32 accumulation."""
    mean_sq = jnp.mean(x * x, axis=1, keepdims=True)
    x = x * jax.lax.rsqrt(mean_sq + eps)
    for l in range(w_stack_bf16.shape[0]):
        y = jnp.dot(x.astype(jnp.bfloat16), w_stack_bf16[l],
                    preferred_element_type=jnp.float32) + b_stack[l]
        x = jnp.maximum(y, 0.2 * y)
    return x


if __name__ == "__main__":
    # Small shapes consistent with the module: x is [batch, mapping_fmaps].
    B = 16
    D = 32             # mapping_fmaps = dlatent_size
    resolution = 1024
    lrmul = 0.01

    key = jax.random.PRNGKey(0)
    kx, kp = jax.random.split(key)
    x = jax.random.normal(kx, (B, D), dtype=jnp.float32)

    w_stack_f32, b_stack = make_g_mapping_params(kp, D, D, lrmul=lrmul)
    w_stack_bf16 = w_stack_f32.astype(jnp.bfloat16)

    out = g_mapping_pallas(x, w_stack_bf16, b_stack)
    out = jax.block_until_ready(out)
    assert out.shape == (B, D)

    num_layers = int(np.log2(resolution)) * 2 - 2   # second element of the module's return
    assert num_layers == 18

    # Correctness: tight check against a precision-matched (bf16-weight) reference,
    # loose check against the full-f32 PyTorch-equivalent reference (bf16 weight
    # quantization is the intentional precision budget).
    ref_bf16 = reference_forward_bf16(x, w_stack_bf16, b_stack)
    np.testing.assert_allclose(np.asarray(out), np.asarray(ref_bf16), rtol=2e-3, atol=2e-3)

    ref_f32 = reference_forward_f32(x, w_stack_f32, b_stack)
    np.testing.assert_allclose(np.asarray(out), np.asarray(ref_f32), rtol=5e-2, atol=5e-2)

    print("KERNEL_OK")
</pallas_src>

<mosaic_0001>
module attributes {stable_mosaic.version = 11 : i64} {
  func.func @g_mapping_kernel(%arg0: i32, %arg1: memref<16x32xf32, #tpu.memory_space<vmem>>, %arg2: memref<8x32x32xbf16, #tpu.memory_space<vmem>>, %arg3: memref<8x32xf32, #tpu.memory_space<vmem>>, %arg4: memref<16x32xf32, #tpu.memory_space<vmem>>) attributes {dimension_semantics = [#tpu.dimension_semantics<parallel>], iteration_bounds = array<i64: 1>, scalar_prefetch = 0 : i64, scratch_operands = 0 : i64, tpu.core_type = #tpu.core_type<tc>, window_params = [{transform_indices = @transform_0, window_bounds = array<i64: 16, 32>}, {pipeline_mode = #tpu.pipeline_mode<synchronous>, transform_indices = @transform_1, window_bounds = array<i64: 8, 32, 32>}, {pipeline_mode = #tpu.pipeline_mode<synchronous>, transform_indices = @transform_2, window_bounds = array<i64: 8, 32>}, {transform_indices = @transform_3, window_bounds = array<i64: 16, 32>}]} {
    %c0 = arith.constant 0 : index
    %c0_0 = arith.constant 0 : index
    %0 = vector.load %arg1[%c0, %c0_0] : memref<16x32xf32, #tpu.memory_space<vmem>>, vector<16x32xf32>
    %1 = arith.mulf %0, %0 : vector<16x32xf32>
    %cst = arith.constant dense<0.000000e+00> : vector<16xf32>
    %2 = vector.multi_reduction <add>, %1, %cst [1] : vector<16x32xf32> to vector<16xf32>
    %3 = vector.shape_cast %2 : vector<16xf32> to vector<16x1xf32>
    %cst_1 = arith.constant 3.200000e+01 : f32
    %4 = vector.broadcast %cst_1 : f32 to vector<16x1xf32>
    %5 = arith.divf %3, %4 : vector<16x1xf32>
    %cst_2 = arith.constant 9.99999993E-9 : f32
    %6 = vector.broadcast %cst_2 : f32 to vector<16x1xf32>
    %7 = arith.addf %5, %6 : vector<16x1xf32>
    %8 = math.rsqrt %7 : vector<16x1xf32>
    %9 = vector.broadcast %8 : vector<16x1xf32> to vector<16x32xf32>
    %10 = arith.mulf %0, %9 : vector<16x32xf32>
    %c0_3 = arith.constant 0 : index
    %c0_4 = arith.constant 0 : index
    %c0_5 = arith.constant 0 : index
    %11 = vector.load %arg2[%c0_3, %c0_4, %c0_5] : memref<8x32x32xbf16, #tpu.memory_space<vmem>>, vector<1x32x32xbf16>
    %12 = vector.shape_cast %11 : vector<1x32x32xbf16> to vector<32x32xbf16>
    %c0_6 = arith.constant 0 : index
    %c0_7 = arith.constant 0 : index
    %13 = vector.load %arg3[%c0_6, %c0_7] : memref<8x32xf32, #tpu.memory_space<vmem>>, vector<1x32xf32>
    %14 = vector.shape_cast %13 : vector<1x32xf32> to vector<32xf32>
    %15 = arith.truncf %10 : vector<16x32xf32> to vector<16x32xbf16>
    %cst_8 = arith.constant dense<0.000000e+00> : vector<16x32xf32>
    %16 = tpu.matmul %15, %12, %cst_8 {dimension_numbers = #tpu.dot_dimension_numbers<[1], [0], [0], [1], [0, 0, 1, 1], [], []>} : vector<16x32xbf16>, vector<32x32xbf16>, vector<16x32xf32> -> vector<16x32xf32>
    %17 = vector.shape_cast %14 : vector<32xf32> to vector<1x32xf32>
    %18 = vector.broadcast %17 : vector<1x32xf32> to vector<16x32xf32>
    %19 = arith.addf %16, %18 : vector<16x32xf32>
    %cst_9 = arith.constant 2.000000e-01 : f32
    %20 = vector.broadcast %cst_9 : f32 to vector<16x32xf32>
    %21 = arith.mulf %20, %19 : vector<16x32xf32>
    %22 = arith.maximumf %19, %21 : vector<16x32xf32>
    %c1 = arith.constant 1 : index
    %c0_10 = arith.constant 0 : index
    %c0_11 = arith.constant 0 : index
    %23 = vector.load %arg2[%c1, %c0_10, %c0_11] : memref<8x32x32xbf16, #tpu.memory_space<vmem>>, vector<1x32x32xbf16>
    %24 = vector.shape_cast %23 : vector<1x32x32xbf16> to vector<32x32xbf16>
    %c1_12 = arith.constant 1 : index
    %c0_13 = arith.constant 0 : index
    %25 = vector.load %arg3[%c1_12, %c0_13] : memref<8x32xf32, #tpu.memory_space<vmem>>, vector<1x32xf32>
    %26 = vector.shape_cast %25 : vector<1x32xf32> to vector<32xf32>
    %27 = arith.truncf %22 : vector<16x32xf32> to vector<16x32xbf16>
    %cst_14 = arith.constant dense<0.000000e+00> : vector<16x32xf32>
    %28 = tpu.matmul %27, %24, %cst_14 {dimension_numbers = #tpu.dot_dimension_numbers<[1], [0], [0], [1], [0, 0, 1, 1], [], []>} : vector<16x32xbf16>, vector<32x32xbf16>, vector<16x32xf32> -> vector<16x32xf32>
    %29 = vector.shape_cast %26 : vector<32xf32> to vector<1x32xf32>
    %30 = vector.broadcast %29 : vector<1x32xf32> to vector<16x32xf32>
    %31 = arith.addf %28, %30 : vector<16x32xf32>
    %cst_15 = arith.constant 2.000000e-01 : f32
    %32 = vector.broadcast %cst_15 : f32 to vector<16x32xf32>
    %33 = arith.mulf %32, %31 : vector<16x32xf32>
    %34 = arith.maximumf %31, %33 : vector<16x32xf32>
    %c2 = arith.constant 2 : index
    %c0_16 = arith.constant 0 : index
    %c0_17 = arith.constant 0 : index
    %35 = vector.load %arg2[%c2, %c0_16, %c0_17] : memref<8x32x32xbf16, #tpu.memory_space<vmem>>, vector<1x32x32xbf16>
    %36 = vector.shape_cast %35 : vector<1x32x32xbf16> to vector<32x32xbf16>
    %c2_18 = arith.constant 2 : index
    %c0_19 = arith.constant 0 : index
    %37 = vector.load %arg3[%c2_18, %c0_19] : memref<8x32xf32, #tpu.memory_space<vmem>>, vector<1x32xf32>
    %38 = vector.shape_cast %37 : vector<1x32xf32> to vector<32xf32>
    %39 = arith.truncf %34 : vector<16x32xf32> to vector<16x32xbf16>
    %cst_20 = arith.constant dense<0.000000e+00> : vector<16x32xf32>
    %40 = tpu.matmul %39, %36, %cst_20 {dimension_numbers = #tpu.dot_dimension_numbers<[1], [0], [0], [1], [0, 0, 1, 1], [], []>} : vector<16x32xbf16>, vector<32x32xbf16>, vector<16x32xf32> -> vector<16x32xf32>
    %41 = vector.shape_cast %38 : vector<32xf32> to vector<1x32xf32>
    %42 = vector.broadcast %41 : vector<1x32xf32> to vector<16x32xf32>
    %43 = arith.addf %40, %42 : vector<16x32xf32>
    %cst_21 = arith.constant 2.000000e-01 : f32
    %44 = vector.broadcast %cst_21 : f32 to vector<16x32xf32>
    %45 = arith.mulf %44, %43 : vector<16x32xf32>
    %46 = arith.maximumf %43, %45 : vector<16x32xf32>
    %c3 = arith.constant 3 : index
    %c0_22 = arith.constant 0 : index
    %c0_23 = arith.constant 0 : index
    %47 = vector.load %arg2[%c3, %c0_22, %c0_23] : memref<8x32x32xbf16, #tpu.memory_space<vmem>>, vector<1x32x32xbf16>
    %48 = vector.shape_cast %47 : vector<1x32x32xbf16> to vector<32x32xbf16>
    %c3_24 = arith.constant 3 : index
    %c0_25 = arith.constant 0 : index
    %49 = vector.load %arg3[%c3_24, %c0_25] : memref<8x32xf32, #tpu.memory_space<vmem>>, vector<1x32xf32>
    %50 = vector.shape_cast %49 : vector<1x32xf32> to vector<32xf32>
    %51 = arith.truncf %46 : vector<16x32xf32> to vector<16x32xbf16>
    %cst_26 = arith.constant dense<0.000000e+00> : vector<16x32xf32>
    %52 = tpu.matmul %51, %48, %cst_26 {dimension_numbers = #tpu.dot_dimension_numbers<[1], [0], [0], [1], [0, 0, 1, 1], [], []>} : vector<16x32xbf16>, vector<32x32xbf16>, vector<16x32xf32> -> vector<16x32xf32>
    %53 = vector.shape_cast %50 : vector<32xf32> to vector<1x32xf32>
    %54 = vector.broadcast %53 : vector<1x32xf32> to vector<16x32xf32>
    %55 = arith.addf %52, %54 : vector<16x32xf32>
    %cst_27 = arith.constant 2.000000e-01 : f32
    %56 = vector.broadcast %cst_27 : f32 to vector<16x32xf32>
    %57 = arith.mulf %56, %55 : vector<16x32xf32>
    %58 = arith.maximumf %55, %57 : vector<16x32xf32>
    %c4 = arith.constant 4 : index
    %c0_28 = arith.constant 0 : index
    %c0_29 = arith.constant 0 : index
    %59 = vector.load %arg2[%c4, %c0_28, %c0_29] : memref<8x32x32xbf16, #tpu.memory_space<vmem>>, vector<1x32x32xbf16>
    %60 = vector.shape_cast %59 : vector<1x32x32xbf16> to vector<32x32xbf16>
    %c4_30 = arith.constant 4 : index
    %c0_31 = arith.constant 0 : index
    %61 = vector.load %arg3[%c4_30, %c0_31] : memref<8x32xf32, #tpu.memory_space<vmem>>, vector<1x32xf32>
    %62 = vector.shape_cast %61 : vector<1x32xf32> to vector<32xf32>
    %63 = arith.truncf %58 : vector<16x32xf32> to vector<16x32xbf16>
    %cst_32 = arith.constant dense<0.000000e+00> : vector<16x32xf32>
    %64 = tpu.matmul %63, %60, %cst_32 {dimension_numbers = #tpu.dot_dimension_numbers<[1], [0], [0], [1], [0, 0, 1, 1], [], []>} : vector<16x32xbf16>, vector<32x32xbf16>, vector<16x32xf32> -> vector<16x32xf32>
    %65 = vector.shape_cast %62 : vector<32xf32> to vector<1x32xf32>
    %66 = vector.broadcast %65 : vector<1x32xf32> to vector<16x32xf32>
    %67 = arith.addf %64, %66 : vector<16x32xf32>
    %cst_33 = arith.constant 2.000000e-01 : f32
    %68 = vector.broadcast %cst_33 : f32 to vector<16x32xf32>
    %69 = arith.mulf %68, %67 : vector<16x32xf32>
    %70 = arith.maximumf %67, %69 : vector<16x32xf32>
    %c5 = arith.constant 5 : index
    %c0_34 = arith.constant 0 : index
    %c0_35 = arith.constant 0 : index
    %71 = vector.load %arg2[%c5, %c0_34, %c0_35] : memref<8x32x32xbf16, #tpu.memory_space<vmem>>, vector<1x32x32xbf16>
    %72 = vector.shape_cast %71 : vector<1x32x32xbf16> to vector<32x32xbf16>
    %c5_36 = arith.constant 5 : index
    %c0_37 = arith.constant 0 : index
    %73 = vector.load %arg3[%c5_36, %c0_37] : memref<8x32xf32, #tpu.memory_space<vmem>>, vector<1x32xf32>
    %74 = vector.shape_cast %73 : vector<1x32xf32> to vector<32xf32>
    %75 = arith.truncf %70 : vector<16x32xf32> to vector<16x32xbf16>
    %cst_38 = arith.constant dense<0.000000e+00> : vector<16x32xf32>
    %76 = tpu.matmul %75, %72, %cst_38 {dimension_numbers = #tpu.dot_dimension_numbers<[1], [0], [0], [1], [0, 0, 1, 1], [], []>} : vector<16x32xbf16>, vector<32x32xbf16>, vector<16x32xf32> -> vector<16x32xf32>
    %77 = vector.shape_cast %74 : vector<32xf32> to vector<1x32xf32>
    %78 = vector.broadcast %77 : vector<1x32xf32> to vector<16x32xf32>
    %79 = arith.addf %76, %78 : vector<16x32xf32>
    %cst_39 = arith.constant 2.000000e-01 : f32
    %80 = vector.broadcast %cst_39 : f32 to vector<16x32xf32>
    %81 = arith.mulf %80, %79 : vector<16x32xf32>
    %82 = arith.maximumf %79, %81 : vector<16x32xf32>
    %c6 = arith.constant 6 : index
    %c0_40 = arith.constant 0 : index
    %c0_41 = arith.constant 0 : index
    %83 = vector.load %arg2[%c6, %c0_40, %c0_41] : memref<8x32x32xbf16, #tpu.memory_space<vmem>>, vector<1x32x32xbf16>
    %84 = vector.shape_cast %83 : vector<1x32x32xbf16> to vector<32x32xbf16>
    %c6_42 = arith.constant 6 : index
    %c0_43 = arith.constant 0 : index
    %85 = vector.load %arg3[%c6_42, %c0_43] : memref<8x32xf32, #tpu.memory_space<vmem>>, vector<1x32xf32>
    %86 = vector.shape_cast %85 : vector<1x32xf32> to vector<32xf32>
    %87 = arith.truncf %82 : vector<16x32xf32> to vector<16x32xbf16>
    %cst_44 = arith.constant dense<0.000000e+00> : vector<16x32xf32>
    %88 = tpu.matmul %87, %84, %cst_44 {dimension_numbers = #tpu.dot_dimension_numbers<[1], [0], [0], [1], [0, 0, 1, 1], [], []>} : vector<16x32xbf16>, vector<32x32xbf16>, vector<16x32xf32> -> vector<16x32xf32>
    %89 = vector.shape_cast %86 : vector<32xf32> to vector<1x32xf32>
    %90 = vector.broadcast %89 : vector<1x32xf32> to vector<16x32xf32>
    %91 = arith.addf %88, %90 : vector<16x32xf32>
    %cst_45 = arith.constant 2.000000e-01 : f32
    %92 = vector.broadcast %cst_45 : f32 to vector<16x32xf32>
    %93 = arith.mulf %92, %91 : vector<16x32xf32>
    %94 = arith.maximumf %91, %93 : vector<16x32xf32>
    %c7 = arith.constant 7 : index
    %c0_46 = arith.constant 0 : index
    %c0_47 = arith.constant 0 : index
    %95 = vector.load %arg2[%c7, %c0_46, %c0_47] : memref<8x32x32xbf16, #tpu.memory_space<vmem>>, vector<1x32x32xbf16>
    %96 = vector.shape_cast %95 : vector<1x32x32xbf16> to vector<32x32xbf16>
    %c7_48 = arith.constant 7 : index
    %c0_49 = arith.constant 0 : index
    %97 = vector.load %arg3[%c7_48, %c0_49] : memref<8x32xf32, #tpu.memory_space<vmem>>, vector<1x32xf32>
    %98 = vector.shape_cast %97 : vector<1x32xf32> to vector<32xf32>
    %99 = arith.truncf %94 : vector<16x32xf32> to vector<16x32xbf16>
    %cst_50 = arith.constant dense<0.000000e+00> : vector<16x32xf32>
    %100 = tpu.matmul %99, %96, %cst_50 {dimension_numbers = #tpu.dot_dimension_numbers<[1], [0], [0], [1], [0, 0, 1, 1], [], []>} : vector<16x32xbf16>, vector<32x32xbf16>, vector<16x32xf32> -> vector<16x32xf32>
    %101 = vector.shape_cast %98 : vector<32xf32> to vector<1x32xf32>
    %102 = vector.broadcast %101 : vector<1x32xf32> to vector<16x32xf32>
    %103 = arith.addf %100, %102 : vector<16x32xf32>
    %cst_51 = arith.constant 2.000000e-01 : f32
    %104 = vector.broadcast %cst_51 : f32 to vector<16x32xf32>
    %105 = arith.mulf %104, %103 : vector<16x32xf32>
    %106 = arith.maximumf %103, %105 : vector<16x32xf32>
    %c0_52 = arith.constant 0 : index
    %c0_53 = arith.constant 0 : index
    %107 = vector.load %arg4[%c0_52, %c0_53] : memref<16x32xf32, #tpu.memory_space<vmem>>, vector<16x32xf32>
    tpu.vector_store %arg4[%c0_52, %c0_53], %106 {strides = array<i32>} : memref<16x32xf32, #tpu.memory_space<vmem>>, vector<16x32xf32>,
    return
  }
  func.func @transform_0(%arg0: i32) -> (i32, i32) {
    %c0_i32 = arith.constant 0 : i32
    %c0_i32_0 = arith.constant 0 : i32
    return %arg0, %c0_i32 : i32, i32
  }
  func.func @transform_1(%arg0: i32) -> (i32, i32, i32) {
    %c0_i32 = arith.constant 0 : i32
    %c0_i32_0 = arith.constant 0 : i32
    %c0_i32_1 = arith.constant 0 : i32
    %c0_i32_2 = arith.constant 0 : i32
    return %c0_i32, %c0_i32_0, %c0_i32_1 : i32, i32, i32
  }
  func.func @transform_2(%arg0: i32) -> (i32, i32) {
    %c0_i32 = arith.constant 0 : i32
    %c0_i32_0 = arith.constant 0 : i32
    %c0_i32_1 = arith.constant 0 : i32
    return %c0_i32, %c0_i32_0 : i32, i32
  }
  func.func @transform_3(%arg0: i32) -> (i32, i32) {
    %c0_i32 = arith.constant 0 : i32
    %c0_i32_0 = arith.constant 0 : i32
    return %arg0, %c0_i32 : i32, i32
  }
}

</mosaic_0001>

<bundles_post_ra>
// kernel: tpu_custom_call.1
= control target key start
LH: loop header
LB: loop body
LE: loop exit
PB: predicated region body
PF: predicated region fallthrough
CT: control target
= control target key end

     0   :  { %8 = vsyncpa [#allocation3], 0  ;;  %s726_s0 = inlined_call_operand.hbm [shape: f32[16,32], index: 0, kind: input, shape index: {}]   ;;  %s727_s1 = inlined_call_operand.hbm [shape: bf16[8,32,32], index: 1, kind: input, shape index: {}]   ;;  %s728_s2 = inlined_call_operand.hbm [shape: f32[8,32], index: 2, kind: input, shape index: {}]   ;;  %s729_s3 = inlined_call_operand.hbm [shape: f32[16,32], index: 3, kind: output, shape index: {}]  }
   0x1   :  { %9 = vsyncpa [#allocation6], 0  ;;  %s28_s14 = sshll.u32 %s727_s1, 4  ;;  %s29_s14 = int_to_ptr.hbm [resolvable:$true] %s28_s14 }
   0x2   :  { %10 = vsyncpa [#allocation4], 0  ;;  %s667_s15 = smov [#allocation5]   ;;  %s15_s19 = sshll.u32 %s726_s0, 4  ;;  %s16_s19 = int_to_ptr.hbm [resolvable:$true] %s15_s19 }
   0x3   :  { %s30_s16 = sshll.u32 %s667_s15, 4  ;;  %s668_s20 = smov 64   ;;  %s31_s16 = int_to_ptr.vmem [resolvable:$true] %s30_s16 }
   0x4   :  { %s669_s21 = smov 4   ;;  %s670_s22 = smov [#allocation2]  }
   0x5   :  { %36 = dma.hbm_to_vmem [thread:$0]  %s29_s14, 2048, %s31_s16, [#allocation6], %s668_s20, %s668_s20, %s669_s21  }
   0x6   :  { %s17_s23 = sshll.u32 %s670_s22, 4  ;;  %s671_s24 = smov 128   ;;  %s18_s23 = int_to_ptr.vmem [resolvable:$true] %s17_s23 }
   0x7   :  { %s672_s25 = smov 8   ;;  %s42_s27 = sshll.u32 %s728_s2, 4  ;;  %s43_s27 = int_to_ptr.hbm [resolvable:$true] %s42_s27 }
   0x8   :  { %23 = dma.hbm_to_vmem [thread:$0]  %s16_s19, 256, %s18_s23, [#allocation3], %s671_s24, %s671_s24, %s672_s25  }
   0x9   :  { %s673_s28 = smov [#allocation7]  }
   0xa   :  { %s44_s0 = sshll.u32 %s673_s28, 4  ;;  %s45_s0 = int_to_ptr.vmem [resolvable:$true] %s44_s0 }
   0xb   :  { %47 = dma.hbm_to_vmem [thread:$0]  %s43_s27, 128, %s45_s0, [#allocation6]  }
   0xc   :  { %661 = dma.done.wait [#allocation3], 256  }
   0xd   :  { %662 = vsyncadd [#allocation3], 4294967040 }
   0xe   :  { %663 = dma.done.wait [#allocation6], 2176  }
   0xf   :  { %664 = vsyncadd [#allocation6], 4294965120  ;;  %v61_v0 = vld [vmem:[#allocation2] sm:$0xff]  ;;  %vm65_vm0 = vcmask 261120   ;;  %v62_v2 = vld [vmem:[#allocation2 + $0x8] sm:$0xff]  ;;  %v674_v6 = vmov 32.0  }
  0x10   :  { %v63_v1 = vmul.f32 %v61_v0, %v61_v0  ;;  %v64_v4 = vmul.f32 %v62_v2, %v62_v2  ;;  %559 = vrcp.f32 %v674_v6  ;;  %v527_v12 = vld [vmem:[#allocation5 + $0x8] sm:$0xff]  ;;  %v526_v13 = vld [vmem:[#allocation5] sm:$0xff]  ;;  %v529_v38 = vld [vmem:[#allocation5 + $0x18] sm:$0xff]  ;;  %s675_s2 = smov [#allocation8]   ;;  %s440_s5 = sshll.u32 %s729_s3, 4  ;;  %s441_s5 = int_to_ptr.hbm [resolvable:$true] %s440_s5 }
  0x11   :  { %133 = vmatpush.bf16.msra.mxu0 %v527_v12  ;;  %174 = vmatpush.bf16.msra.mxu1 %v529_v38  ;;  %v528_v39 = vld [vmem:[#allocation5 + $0x10] sm:$0xff]  ;;  %v551_v41 = vld [vmem:[#allocation7] ss:$0 sm:$0xff]  ;;  %v531_v50 = vld [vmem:[#allocation5 + $0x28] sm:$0xff]  ;;  %s438_s29 = sshll.u32 %s675_s2, 4  ;;  %s439_s29 = int_to_ptr.vmem [resolvable:$true] %s438_s29 }
  0x12   :  { %v66_v3 = vsel %vm65_vm0, %v63_v1, 0.0  ;;  %v69_v5 = vsel %vm65_vm0, %v64_v4, 0.0  ;;  %215 = vmatpush.bf16.msra.mxu2 %v531_v50  ;;  %v530_v51 = vld [vmem:[#allocation5 + $0x20] sm:$0xff]  ;;  %v533_v62 = vld [vmem:[#allocation5 + $0x38] sm:$0xff]  ;;  %v532_v63 = vld [vmem:[#allocation5 + $0x30] sm:$0xff] }
  0x13   :  { %67 = vadd.xlane.f32.xlu0 %v66_v3  ;;  %v552_v53 = vld [vmem:[#allocation7 + $0x1] ss:$0 sm:$0xff]  ;;  %256 = vmatpush.bf16.msra.mxu3 %v533_v62  ;;  %v553_v1 = vld [vmem:[#allocation7 + $0x2] ss:$0 sm:$0xff] }
  0x15   :  { %134 = vmatpush.bf16.msra.mxu0 %v526_v13  ;;  %175 = vmatpush.bf16.msra.mxu1 %v528_v39  ;;  %v554_v13 = vld [vmem:[#allocation7 + $0x3] ss:$0 sm:$0xff] }
  0x16   :  { %v560_v7 = vpop.eup %559  ;;  %216 = vmatpush.bf16.msra.mxu2 %v530_v51 }
  0x17   :  { %v73_v8 = vmul.f32 32.0, %v560_v7  ;;  %vm77_vm1 = vweird.f32 %v560_v7  ;;  %257 = vmatpush.bf16.msra.mxu3 %v532_v63 }
  0x19   :  { %v74_v9 = vsub.f32 1.0, %v73_v8 }
  0x1b   :  { %70 = vadd.xlane.f32.xlu0 %v69_v5  ;;  %v75_v10 = vmul.f32 %v560_v7, %v74_v9 }
  0x1d   :  { %v76_v11 = vadd.f32 %v560_v7, %v75_v10  ;;  %v535_v10 = vld [vmem:[#allocation5 + $0x48] sm:$0xff] }
  0x1e   :  { %297 = vmatpush.bf16.msrb.mxu0 %v535_v10 }
  0x1f   :  { %v78_v14 = vsel %vm77_vm1, %v560_v7, %v76_v11  ;;  %v534_v11 = vld [vmem:[#allocation5 + $0x40] sm:$0xff] }
  0x22   :  { %298 = vmatpush.bf16.msrb.mxu0 %v534_v11 }
  0x86   :  { %v68_v15 = vpop.xlane.xlu0 %67 }
  0x87   :  { %v79_v16 = vmul.f32 %v78_v14, %v68_v15 }
  0x89   :  { %v81_v17 = vadd.f32 1e-08, %v79_v16 }
  0x8b   :  { %561 = vrsqrt.f32 %v81_v17  ;;  %vm89_vm3 = vweird.f32 %v81_v17 }
  0x8e   :  { %v71_v18 = vpop.xlane.xlu0 %70 }
  0x8f   :  { %v80_v19 = vmul.f32 %v78_v14, %v71_v18 }
  0x91   :  { %v562_v20 = vpop.eup %561  ;;  %v82_v21 = vadd.f32 1e-08, %v80_v19 }
  0x92   :  { %v84_v22 = vmul.f32 %v562_v20, %v81_v17  ;;  %vm90_vm2 = vweird.f32 %v562_v20 }
  0x93   :  { %563 = vrsqrt.f32 %v82_v21  ;;  %vm91_vm5 = vmor %vm89_vm3, %vm90_vm2  ;;  %vm99_vm6 = vweird.f32 %v82_v21 }
  0x94   :  { %v85_v23 = vmul.f32 %v562_v20, %v84_v22  ;;  %v537_v22 = vld [vmem:[#allocation5 + $0x58] sm:$0xff] }
  0x95   :  { %338 = vmatpush.bf16.msrb.mxu1 %v537_v22 }
  0x96   :  { %v86_v24 = vmul.f32 0.5, %v85_v23  ;;  %v536_v23 = vld [vmem:[#allocation5 + $0x50] sm:$0xff] }
  0x98   :  { %v87_v26 = vsub.f32 1.5, %v86_v24 }
  0x99   :  { %v564_v25 = vpop.eup %563  ;;  %339 = vmatpush.bf16.msrb.mxu1 %v536_v23 }
  0x9a   :  { %v94_v27 = vmul.f32 %v564_v25, %v82_v21  ;;  %v88_v29 = vmul.f32 %v562_v20, %v87_v26  ;;  %vm100_vm4 = vweird.f32 %v564_v25 }
  0x9b   :  { %vm101_vm7 = vmor %vm99_vm6, %vm100_vm4 }
  0x9c   :  { %v95_v28 = vmul.f32 %v564_v25, %v94_v27  ;;  %v92_v33 = vsel %vm91_vm5, %v562_v20, %v88_v29 }
  0x9d   :  { %v103_v35 = vmul.f32 %v92_v33, %v61_v0 }
  0x9e   :  { %v96_v30 = vmul.f32 0.5, %v95_v28 }
  0xa0   :  { %v97_v31 = vsub.f32 1.5, %v96_v30 }
  0xa2   :  { %v98_v32 = vmul.f32 %v564_v25, %v97_v31 }
  0xa4   :  { %v102_v34 = vsel %vm101_vm7, %v564_v25, %v98_v32  ;;  %v555_v25 = vld [vmem:[#allocation7 + $0x4] ss:$0 sm:$0xff] }
  0xa5   :  { %v104_v36 = vmul.f32 %v102_v34, %v62_v2  ;;  %v539_v34 = vld [vmem:[#allocation5 + $0x68] sm:$0xff] }
  0xa6   :  { %379 = vmatpush.bf16.msrb.mxu2 %v539_v34 }
  0xa7   :  { %v110_v37 = vpack.c.bf16 %v104_v36, %v103_v35  ;;  %v538_v35 = vld [vmem:[#allocation5 + $0x60] sm:$0xff] }
  0xa9   :  { %462 = vmatmul.msk.bf16.vlgmr.msra.gmra.mxu0 %vm65_vm0, %v110_v37  ;;  %v556_v37 = vld [vmem:[#allocation7 + $0x5] ss:$0 sm:$0xff] }
  0xaa   :  { %380 = vmatpush.bf16.msrb.mxu2 %v538_v35 }
 0x126   :  { %v136_v40 = vpop.f32.mrf.mxu0 }
 0x127   :  { %v137_v42 = vadd.f32 %v551_v41, %v136_v40 }
 0x129   :  { %v141_v44 = vmul.f32 0.2, %v137_v42 }
 0x12b   :  { %v143_v47 = vmax.f32 %v137_v42, %v141_v44 }
 0x12e   :  { %v138_v43 = vpop.f32.mrf.mxu0 }
 0x12f   :  { %v139_v45 = vadd.f32 %v551_v41, %v138_v43 }
 0x131   :  { %v142_v46 = vmul.f32 0.2, %v139_v45 }
 0x133   :  { %v144_v48 = vmax.f32 %v139_v45, %v142_v46  ;;  %v541_v46 = vld [vmem:[#allocation5 + $0x78] sm:$0xff] }
 0x134   :  { %420 = vmatpush.bf16.msrb.mxu3 %v541_v46 }
 0x135   :  { %v151_v49 = vpack.c.bf16 %v144_v48, %v143_v47  ;;  %v540_v47 = vld [vmem:[#allocation5 + $0x70] sm:$0xff] }
 0x137   :  { %471 = vmatmul.msk.bf16.vlgmr.msra.gmra.mxu1 %vm65_vm0, %v151_v49  ;;  %v557_v49 = vld [vmem:[#allocation7 + $0x6] ss:$0 sm:$0xff] }
 0x138   :  { %421 = vmatpush.bf16.msrb.mxu3 %v540_v47 }
 0x1b4   :  { %v177_v52 = vpop.f32.mrf.mxu1 }
 0x1b5   :  { %v178_v54 = vadd.f32 %v552_v53, %v177_v52 }
 0x1b7   :  { %v182_v56 = vmul.f32 0.2, %v178_v54 }
 0x1b9   :  { %v184_v59 = vmax.f32 %v178_v54, %v182_v56 }
 0x1bc   :  { %v179_v55 = vpop.f32.mrf.mxu1 }
 0x1bd   :  { %v180_v57 = vadd.f32 %v552_v53, %v179_v55 }
 0x1bf   :  { %v183_v58 = vmul.f32 0.2, %v180_v57 }
 0x1c1   :  { %v185_v60 = vmax.f32 %v180_v57, %v183_v58  ;;  %v558_v58 = vld [vmem:[#allocation7 + $0x7] ss:$0 sm:$0xff] }
 0x1c3   :  { %v192_v61 = vpack.c.bf16 %v185_v60, %v184_v59 }
 0x1c5   :  { %480 = vmatmul.msk.bf16.vlgmr.msra.gmra.mxu2 %vm65_vm0, %v192_v61 }
 0x248   :  { %v218_v0 = vpop.f32.mrf.mxu2 }
 0x249   :  { %v219_v2 = vadd.f32 %v553_v1, %v218_v0 }
 0x24b   :  { %v223_v4 = vmul.f32 0.2, %v219_v2 }
 0x24d   :  { %v225_v7 = vmax.f32 %v219_v2, %v223_v4 }
 0x250   :  { %v220_v3 = vpop.f32.mrf.mxu2 }
 0x251   :  { %v221_v5 = vadd.f32 %v553_v1, %v220_v3 }
 0x253   :  { %v224_v6 = vmul.f32 0.2, %v221_v5 }
 0x255   :  { %v226_v8 = vmax.f32 %v221_v5, %v224_v6 }
 0x257   :  { %v233_v9 = vpack.c.bf16 %v226_v8, %v225_v7 }
 0x259   :  { %489 = vmatmul.msk.bf16.vlgmr.msra.gmra.mxu3 %vm65_vm0, %v233_v9 }
 0x2dc   :  { %v259_v12 = vpop.f32.mrf.mxu3 }
 0x2dd   :  { %v260_v14 = vadd.f32 %v554_v13, %v259_v12 }
 0x2df   :  { %v264_v16 = vmul.f32 0.2, %v260_v14 }
 0x2e1   :  { %v266_v19 = vmax.f32 %v260_v14, %v264_v16 }
 0x2e4   :  { %v261_v15 = vpop.f32.mrf.mxu3 }
 0x2e5   :  { %v262_v17 = vadd.f32 %v554_v13, %v261_v15 }
 0x2e7   :  { %v265_v18 = vmul.f32 0.2, %v262_v17 }
 0x2e9   :  { %v267_v20 = vmax.f32 %v262_v17, %v265_v18 }
 0x2eb   :  { %v274_v21 = vpack.c.bf16 %v267_v20, %v266_v19 }
 0x2ed   :  { %498 = vmatmul.msk.bf16.vlgmr.msrb.gmra.mxu0 %vm65_vm0, %v274_v21 }
 0x36a   :  { %v300_v24 = vpop.f32.mrf.mxu0 }
 0x36b   :  { %v301_v26 = vadd.f32 %v555_v25, %v300_v24 }
 0x36d   :  { %v305_v28 = vmul.f32 0.2, %v301_v26 }
 0x36f   :  { %v307_v31 = vmax.f32 %v301_v26, %v305_v28 }
 0x372   :  { %v302_v27 = vpop.f32.mrf.mxu0 }
 0x373   :  { %v303_v29 = vadd.f32 %v555_v25, %v302_v27 }
 0x375   :  { %v306_v30 = vmul.f32 0.2, %v303_v29 }
 0x377   :  { %v308_v32 = vmax.f32 %v303_v29, %v306_v30 }
 0x379   :  { %v315_v33 = vpack.c.bf16 %v308_v32, %v307_v31 }
 0x37b   :  { %507 = vmatmul.msk.bf16.vlgmr.msrb.gmra.mxu1 %vm65_vm0, %v315_v33 }
 0x3f8   :  { %v341_v36 = vpop.f32.mrf.mxu1 }
 0x3f9   :  { %v342_v38 = vadd.f32 %v556_v37, %v341_v36 }
 0x3fb   :  { %v346_v40 = vmul.f32 0.2, %v342_v38 }
 0x3fd   :  { %v348_v43 = vmax.f32 %v342_v38, %v346_v40 }
 0x400   :  { %v343_v39 = vpop.f32.mrf.mxu1 }
 0x401   :  { %v344_v41 = vadd.f32 %v556_v37, %v343_v39 }
 0x403   :  { %v347_v42 = vmul.f32 0.2, %v344_v41 }
 0x405   :  { %v349_v44 = vmax.f32 %v344_v41, %v347_v42 }
 0x407   :  { %v356_v45 = vpack.c.bf16 %v349_v44, %v348_v43 }
 0x409   :  { %516 = vmatmul.msk.bf16.vlgmr.msrb.gmra.mxu2 %vm65_vm0, %v356_v45 }
 0x48c   :  { %v382_v48 = vpop.f32.mrf.mxu2 }
 0x48d   :  { %v383_v50 = vadd.f32 %v557_v49, %v382_v48 }
 0x48f   :  { %v387_v52 = vmul.f32 0.2, %v383_v50 }
 0x491   :  { %v389_v55 = vmax.f32 %v383_v50, %v387_v52 }
 0x494   :  { %v384_v51 = vpop.f32.mrf.mxu2 }
 0x495   :  { %v385_v53 = vadd.f32 %v557_v49, %v384_v51 }
 0x497   :  { %v388_v54 = vmul.f32 0.2, %v385_v53 }
 0x499   :  { %v390_v56 = vmax.f32 %v385_v53, %v388_v54 }
 0x49b   :  { %v397_v57 = vpack.c.bf16 %v390_v56, %v389_v55 }
 0x49d   :  { %525 = vmatmul.msk.bf16.vlgmr.msrb.gmra.mxu3 %vm65_vm0, %v397_v57 }
 0x520   :  { %v423_v59 = vpop.f32.mrf.mxu3 }
 0x521   :  { %v424_v60 = vadd.f32 %v558_v58, %v423_v59 }
 0x523   :  { %v428_v61 = vmul.f32 0.2, %v424_v60 }
 0x525   :  { %v430_v62 = vmax.f32 %v424_v60, %v428_v61 }
 0x527   :  { %432 = vst.msk [vmem:[#allocation8] sm:$0xff] %vm65_vm0, %v430_v62 }
 0x528   :  { %v425_v63 = vpop.f32.mrf.mxu3 }
 0x529   :  { %v426_v0 = vadd.f32 %v558_v58, %v425_v63 }
 0x52b   :  { %v429_v1 = vmul.f32 0.2, %v426_v0 }
 0x52d   :  { %v431_v2 = vmax.f32 %v426_v0, %v429_v1 }
 0x52f   :  { %433 = vst.msk [vmem:[#allocation8 + $0x8] sm:$0xff] %vm65_vm0, %v431_v2 }
 0x530   :  { %446 = dma.vmem_to_hbm [thread:$0]  %s439_s29, 256, %s441_s5, [#allocation4], %s671_s24, %s671_s24, %s672_s25  }
 0x531   :  { %665 = dma.done.wait [#allocation4], 256  }
 0x532   :  { %666 = vsyncadd [#allocation4], 4294967040 }
 0x533   :  { %451 = vsyncpa [#allocation3], 1 }
 0x534   :  { %452 = vsyncpa [#allocation6], 1 }
 0x535   :  { %453 = vsyncpa [#allocation4], 1 }

</bundles_post_ra>
